<compile_context>
chip_gen: v7x
topology: tpu7x:2x2x1
jax: 0.10.0
libtpu: 0.0.40
codegen_flags: <defaults>
</compile_context>

<pallas_src>
import functools

import jax
import jax.numpy as jnp
from jax.experimental import pallas as pl
from jax.experimental.pallas import tpu as pltpu

_EPS = 1e-5
_SUBLANE = 8
_VMEM_LIMIT = 48 * 1024 * 1024   # < 64 MiB physical VMEM on v7x; fine on v5e/v6e
_MAX_TM = 512                    # row tile: amortizes per-step overhead, VMEM-safe


def _round_up(x, m):
    return (x + m - 1) // m * m


# ----------------------------- Pallas kernels ------------------------------ #

def _conv_stats_kernel(p_ref, w_ref, y_ref, sum_ref, ssq_ref):
    """Pass 1: y = patches @ W (MXU) + per-channel sum / sum-of-squares accum.

    p_ref: (tm, K)   w_ref: (K, C)
    y_ref: (tm, C)   sum_ref/ssq_ref: (1, C) resident accumulators.
    Zero-padded rows (M padding) contribute nothing to the sums.
    """
    @pl.when(pl.program_id(0) == 0)
    def _init():
        sum_ref[...] = jnp.zeros_like(sum_ref)
        ssq_ref[...] = jnp.zeros_like(ssq_ref)

    y = jnp.dot(p_ref[...], w_ref[...], preferred_element_type=jnp.float32)
    y_ref[...] = y
    sum_ref[...] += jnp.sum(y, axis=0, keepdims=True)
    ssq_ref[...] += jnp.sum(y * y, axis=0, keepdims=True)


def _bn_relu_kernel(y_ref, sum_ref, ssq_ref, g_ref, b_ref, o_ref, *, inv_count):
    """Pass 2: BatchNorm folded to one per-channel scale/shift sweep + ReLU.

    mean/var come from the globally accumulated sum / sum-of-squares with the
    true (unpadded) row count as divisor; rsqrt goes to the EUP slot.
    """
    mean = sum_ref[...] * inv_count                       # (1, C)
    var = ssq_ref[...] * inv_count - mean * mean          # biased variance
    scale = g_ref[...] * jax.lax.rsqrt(var + _EPS)        # (1, C)
    shift = b_ref[...] - mean * scale
    o_ref[...] = jnp.maximum(y_ref[...] * scale + shift, 0.0)


def _mlp_kernel(x_ref, w1_ref, b1_ref, w2_ref, b2_ref, o_ref):
    """Linear -> ReLU -> Linear on one row tile (hidden stays in VMEM/vregs)."""
    h = jnp.dot(x_ref[...], w1_ref[...], preferred_element_type=jnp.float32)
    h = jnp.maximum(h + b1_ref[...], 0.0)
    o_ref[...] = jnp.dot(h, w2_ref[...], preferred_element_type=jnp.float32) + b2_ref[...]


# ------------------------------ pallas_call glue ---------------------------- #

def conv_bn_relu_pallas(patches, w_mat, gamma, beta, m_true, tm):
    """patches: (M_pad, K), w_mat: (K, C), gamma/beta: (1, C)."""
    m_pad, k = patches.shape
    c = w_mat.shape[1]
    n_tiles = m_pad // tm

    y, s, ss = pl.pallas_call(
        _conv_stats_kernel,
        out_shape=(jax.ShapeDtypeStruct((m_pad, c), jnp.float32),
                   jax.ShapeDtypeStruct((1, c), jnp.float32),
                   jax.ShapeDtypeStruct((1, c), jnp.float32)),
        grid=(n_tiles,),
        in_specs=[
            pl.BlockSpec((tm, k), lambda i: (i, 0)),
            pl.BlockSpec((k, c), lambda i: (0, 0)),
        ],
        out_specs=(
            pl.BlockSpec((tm, c), lambda i: (i, 0)),
            pl.BlockSpec((1, c), lambda i: (0, 0)),   # resident accumulator
            pl.BlockSpec((1, c), lambda i: (0, 0)),   # resident accumulator
        ),
        compiler_params=pltpu.CompilerParams(
            dimension_semantics=("arbitrary",),       # global-stat accumulation
            vmem_limit_bytes=_VMEM_LIMIT),
    )(patches, w_mat)

    out = pl.pallas_call(
        functools.partial(_bn_relu_kernel, inv_count=1.0 / float(m_true)),
        out_shape=jax.ShapeDtypeStruct((m_pad, c), jnp.float32),
        grid=(n_tiles,),
        in_specs=[
            pl.BlockSpec((tm, c), lambda i: (i, 0)),
            pl.BlockSpec((1, c), lambda i: (0, 0)),
            pl.BlockSpec((1, c), lambda i: (0, 0)),
            pl.BlockSpec((1, c), lambda i: (0, 0)),
            pl.BlockSpec((1, c), lambda i: (0, 0)),
        ],
        out_specs=pl.BlockSpec((tm, c), lambda i: (i, 0)),
        compiler_params=pltpu.CompilerParams(
            dimension_semantics=("parallel",),
            vmem_limit_bytes=_VMEM_LIMIT),
    )(y, s, ss, gamma, beta)
    return out


def mlp_pallas(x, w1, b1, w2, b2, tn):
    """x: (N_pad, F); w1: (F, H); w2: (H, E); b1: (1, H); b2: (1, E)."""
    n_pad, f = x.shape
    h = w1.shape[1]
    e = w2.shape[1]
    n_tiles = n_pad // tn
    return pl.pallas_call(
        _mlp_kernel,
        out_shape=jax.ShapeDtypeStruct((n_pad, e), jnp.float32),
        grid=(n_tiles,),
        in_specs=[
            pl.BlockSpec((tn, f), lambda i: (i, 0)),
            pl.BlockSpec((f, h), lambda i: (0, 0)),
            pl.BlockSpec((1, h), lambda i: (0, 0)),
            pl.BlockSpec((h, e), lambda i: (0, 0)),
            pl.BlockSpec((1, e), lambda i: (0, 0)),
        ],
        out_specs=pl.BlockSpec((tn, e), lambda i: (i, 0)),
        compiler_params=pltpu.CompilerParams(
            dimension_semantics=("parallel",),
            vmem_limit_bytes=_VMEM_LIMIT),
    )(x, w1, b1, w2, b2)


# ------------------------------- host-side glue ----------------------------- #

def im2col_nhwc(x, kh, kw, stride):
    """x: (N, H, W, C) -> patches (N*OH*OW, KH*KW*C); column order = (kh, kw, c)."""
    n, h, w, c = x.shape
    oh = (h - kh) // stride + 1
    ow = (w - kw) // stride + 1
    cols = []
    for i in range(kh):
        for j in range(kw):
            cols.append(x[:, i:i + stride * oh:stride, j:j + stride * ow:stride, :])
    p = jnp.stack(cols, axis=3)                     # (N, oh, ow, kh*kw, C)
    return p.reshape(n * oh * ow, kh * kw * c), oh, ow


def prepare_params(conv_params, lin_params, last_out_dims):
    """One-time weight prep: reshape/transpose outside the traced forward."""
    conv_layers = []
    for (w, _b, gamma, beta, stride) in conv_params:
        # Conv bias _b is dropped: it is cancelled by BatchNorm's mean subtraction.
        cout, cin, kh, kw = w.shape
        k = kh * kw * cin
        # Match im2col's (kh, kw, c) column ordering.
        w_mat = jnp.transpose(w, (2, 3, 1, 0)).reshape(k, cout)
        conv_layers.append(dict(w_mat=w_mat,
                                gamma=gamma.reshape(1, cout),
                                beta=beta.reshape(1, cout),
                                kh=kh, kw=kw, stride=stride, cout=cout))

    w1, b1, w2, b2 = lin_params
    c_last, y_last, x_last = last_out_dims
    flat = c_last * y_last * x_last
    fc = w1.shape[0]
    enc = w2.shape[0]
    # Fold torch's C-major Flatten order into a permutation of w1's columns so the
    # forward can flatten NHWC activations directly (no final transpose).
    perm = jnp.arange(flat).reshape(c_last, y_last, x_last).transpose(1, 2, 0).reshape(-1)
    w1m = w1[:, perm].T                              # (F, fc)
    b1v = b1.reshape(1, fc)
    w2m = w2.T                                       # (fc, enc)
    b2v = b2.reshape(1, enc)
    return dict(conv_layers=conv_layers, lin=(w1m, b1v, w2m, b2v), encoded_dim=enc)


def encoder_forward(x_nchw, prep):
    """x_nchw: (N, C, H, W) as in PyTorch.  Activations kept NHWC internally."""
    x = jnp.transpose(x_nchw, (0, 2, 3, 1))          # one-time NCHW -> NHWC
    n = x.shape[0]

    for layer in prep["conv_layers"]:
        patches, oh, ow = im2col_nhwc(x, layer["kh"], layer["kw"], layer["stride"])
        m = patches.shape[0]
        tm = _MAX_TM if m >= _MAX_TM else _round_up(m, _SUBLANE)
        m_pad = _round_up(m, tm)
        patches = jnp.pad(patches, ((0, m_pad - m), (0, 0)))   # row padding only
        y = conv_bn_relu_pallas(patches, layer["w_mat"], layer["gamma"],
                                layer["beta"], m, tm)
        x = y[:m].reshape(n, oh, ow, layer["cout"])            # contiguous -> NHWC

    flat = x.reshape(n, -1)                           # NHWC flatten (w1 pre-permuted)
    w1m, b1v, w2m, b2v = prep["lin"]
    tn = _MAX_TM if n >= _MAX_TM else _round_up(n, _SUBLANE)
    n_pad = _round_up(n, tn)
    flat = jnp.pad(flat, ((0, n_pad - n), (0, 0)))
    out = mlp_pallas(flat, w1m, b1v, w2m, b2v, tn)
    return out[:n, :prep["encoded_dim"]]


def init_params(key, conv_cfgs, fc_size, encoded_dim, flat_dim):
    conv_params = []
    for (cin, cout, k, stride) in conv_cfgs:
        key, kw_, kb_ = jax.random.split(key, 3)
        bound = 1.0 / float(cin * k * k) ** 0.5
        w = jax.random.uniform(kw_, (cout, cin, k, k), jnp.float32, -bound, bound)
        b = jax.random.uniform(kb_, (cout,), jnp.float32, -bound, bound)
        gamma = jnp.ones((cout,), jnp.float32)
        beta = jnp.zeros((cout,), jnp.float32)
        conv_params.append((w, b, gamma, beta, stride))

    key, k1, k2, k3, k4 = jax.random.split(key, 5)
    bound1 = 1.0 / float(flat_dim) ** 0.5
    w1 = jax.random.uniform(k1, (fc_size, flat_dim), jnp.float32, -bound1, bound1)
    b1 = jax.random.uniform(k2, (fc_size,), jnp.float32, -bound1, bound1)
    bound2 = 1.0 / float(fc_size) ** 0.5
    w2 = jax.random.uniform(k3, (encoded_dim, fc_size), jnp.float32, -bound2, bound2)
    b2 = jax.random.uniform(k4, (encoded_dim,), jnp.float32, -bound2, bound2)
    return conv_params, (w1, b1, w2, b2)


if __name__ == "__main__":
    # Small deterministic config:
    #   input  : (N=2, C=4, H=16, W=16)
    #   conv1  : 4 ->  8, k=3, s=2  => 7x7
    #   conv2  : 8 -> 16, k=3, s=2  => 3x3
    #   flatten: 16*3*3 = 144 -> fc_size=32 -> encoded_space_dim=8
    key = jax.random.PRNGKey(0)
    key, kx = jax.random.split(key)
    x = jax.random.normal(kx, (2, 4, 16, 16), jnp.float32)

    conv_cfgs = [(4, 8, 3, 2), (8, 16, 3, 2)]
    last_out_dims = (16, 3, 3)
    flat_dim = 16 * 3 * 3
    fc_size = 32
    encoded_space_dim = 8

    conv_params, lin_params = init_params(key, conv_cfgs, fc_size,
                                          encoded_space_dim, flat_dim)
    prep = prepare_params(conv_params, lin_params, last_out_dims)

    forward = jax.jit(lambda inp: encoder_forward(inp, prep))
    out = forward(x)
    out = jax.block_until_ready(out)
    assert out.shape == (2, encoded_space_dim), out.shape
    print("KERNEL_OK")
</pallas_src>

<mosaic_0001>
module attributes {stable_mosaic.version = 11 : i64} {
  func.func @_conv_stats_kernel(%arg0: i32, %arg1: memref<104x36xf32, #tpu.memory_space<vmem>>, %arg2: memref<36x8xf32, #tpu.memory_space<vmem>>, %arg3: memref<104x8xf32, #tpu.memory_space<vmem>>, %arg4: memref<1x8xf32, #tpu.memory_space<vmem>>, %arg5: memref<1x8xf32, #tpu.memory_space<vmem>>) attributes {dimension_semantics = [#tpu.dimension_semantics<arbitrary>], iteration_bounds = array<i64: 1>, scalar_prefetch = 0 : i64, scratch_operands = 0 : i64, tpu.core_type = #tpu.core_type<tc>, window_params = [{transform_indices = @transform_0, window_bounds = array<i64: 104, 36>}, {pipeline_mode = #tpu.pipeline_mode<synchronous>, transform_indices = @transform_1, window_bounds = array<i64: 36, 8>}, {transform_indices = @transform_2, window_bounds = array<i64: 104, 8>}, {pipeline_mode = #tpu.pipeline_mode<synchronous>, transform_indices = @transform_3, window_bounds = array<i64: 1, 8>}, {pipeline_mode = #tpu.pipeline_mode<synchronous>, transform_indices = @transform_4, window_bounds = array<i64: 1, 8>}]} {
    %c0_i32 = arith.constant 0 : i32
    %0 = arith.cmpi eq, %arg0, %c0_i32 : i32
    %1 = arith.extui %0 : i1 to i32
    %c0_i32_0 = arith.constant 0 : i32
    %2 = arith.cmpi ne, %1, %c0_i32_0 : i32
    scf.if %2 {
      %cst_16 = arith.constant 0.000000e+00 : f32
      %18 = vector.broadcast %cst_16 : f32 to vector<1x8xf32>
      %c0_17 = arith.constant 0 : index
      %c0_18 = arith.constant 0 : index
      %19 = vector.load %arg4[%c0_17, %c0_18] : memref<1x8xf32, #tpu.memory_space<vmem>>, vector<1x8xf32>
      tpu.vector_store %arg4[%c0_17, %c0_18], %18 {strides = array<i32>} : memref<1x8xf32, #tpu.memory_space<vmem>>, vector<1x8xf32>,
      %cst_19 = arith.constant 0.000000e+00 : f32
      %20 = vector.broadcast %cst_19 : f32 to vector<1x8xf32>
      %c0_20 = arith.constant 0 : index
      %c0_21 = arith.constant 0 : index
      %21 = vector.load %arg5[%c0_20, %c0_21] : memref<1x8xf32, #tpu.memory_space<vmem>>, vector<1x8xf32>
      tpu.vector_store %arg5[%c0_20, %c0_21], %20 {strides = array<i32>} : memref<1x8xf32, #tpu.memory_space<vmem>>, vector<1x8xf32>,
    } else {
    }
    %c0 = arith.constant 0 : index
    %c0_1 = arith.constant 0 : index
    %3 = vector.load %arg1[%c0, %c0_1] : memref<104x36xf32, #tpu.memory_space<vmem>>, vector<104x36xf32>
    %c0_2 = arith.constant 0 : index
    %c0_3 = arith.constant 0 : index
    %4 = vector.load %arg2[%c0_2, %c0_3] : memref<36x8xf32, #tpu.memory_space<vmem>>, vector<36x8xf32>
    %cst = arith.constant dense<0.000000e+00> : vector<104x8xf32>
    %5 = tpu.matmul %3, %4, %cst {dimension_numbers = #tpu.dot_dimension_numbers<[1], [0], [0], [1], [0, 0, 1, 1], [], []>} : vector<104x36xf32>, vector<36x8xf32>, vector<104x8xf32> -> vector<104x8xf32>
    %c0_4 = arith.constant 0 : index
    %c0_5 = arith.constant 0 : index
    %6 = vector.load %arg3[%c0_4, %c0_5] : memref<104x8xf32, #tpu.memory_space<vmem>>, vector<104x8xf32>
    tpu.vector_store %arg3[%c0_4, %c0_5], %5 {strides = array<i32>} : memref<104x8xf32, #tpu.memory_space<vmem>>, vector<104x8xf32>,
    %c0_6 = arith.constant 0 : index
    %c0_7 = arith.constant 0 : index
    %7 = vector.load %arg4[%c0_6, %c0_7] : memref<1x8xf32, #tpu.memory_space<vmem>>, vector<1x8xf32>
    %cst_8 = arith.constant dense<0.000000e+00> : vector<8xf32>
    %8 = vector.multi_reduction <add>, %5, %cst_8 [0] : vector<104x8xf32> to vector<8xf32>
    %9 = vector.shape_cast %8 : vector<8xf32> to vector<1x8xf32>
    %10 = arith.addf %7, %9 : vector<1x8xf32>
    %c0_9 = arith.constant 0 : index
    %c0_10 = arith.constant 0 : index
    %11 = vector.load %arg4[%c0_9, %c0_10] : memref<1x8xf32, #tpu.memory_space<vmem>>, vector<1x8xf32>
    tpu.vector_store %arg4[%c0_9, %c0_10], %10 {strides = array<i32>} : memref<1x8xf32, #tpu.memory_space<vmem>>, vector<1x8xf32>,
    %c0_11 = arith.constant 0 : index
    %c0_12 = arith.constant 0 : index
    %12 = vector.load %arg5[%c0_11, %c0_12] : memref<1x8xf32, #tpu.memory_space<vmem>>, vector<1x8xf32>
    %13 = arith.mulf %5, %5 : vector<104x8xf32>
    %cst_13 = arith.constant dense<0.000000e+00> : vector<8xf32>
    %14 = vector.multi_reduction <add>, %13, %cst_13 [0] : vector<104x8xf32> to vector<8xf32>
    %15 = vector.shape_cast %14 : vector<8xf32> to vector<1x8xf32>
    %16 = arith.addf %12, %15 : vector<1x8xf32>
    %c0_14 = arith.constant 0 : index
    %c0_15 = arith.constant 0 : index
    %17 = vector.load %arg5[%c0_14, %c0_15] : memref<1x8xf32, #tpu.memory_space<vmem>>, vector<1x8xf32>
    tpu.vector_store %arg5[%c0_14, %c0_15], %16 {strides = array<i32>} : memref<1x8xf32, #tpu.memory_space<vmem>>, vector<1x8xf32>,
    return
  }
  func.func @transform_0(%arg0: i32) -> (i32, i32) {
    %c0_i32 = arith.constant 0 : i32
    %c0_i32_0 = arith.constant 0 : i32
    return %arg0, %c0_i32 : i32, i32
  }
  func.func @transform_1(%arg0: i32) -> (i32, i32) {
    %c0_i32 = arith.constant 0 : i32
    %c0_i32_0 = arith.constant 0 : i32
    %c0_i32_1 = arith.constant 0 : i32
    return %c0_i32, %c0_i32_0 : i32, i32
  }
  func.func @transform_2(%arg0: i32) -> (i32, i32) {
    %c0_i32 = arith.constant 0 : i32
    %c0_i32_0 = arith.constant 0 : i32
    return %arg0, %c0_i32 : i32, i32
  }
  func.func @transform_3(%arg0: i32) -> (i32, i32) {
    %c0_i32 = arith.constant 0 : i32
    %c0_i32_0 = arith.constant 0 : i32
    %c0_i32_1 = arith.constant 0 : i32
    return %c0_i32, %c0_i32_0 : i32, i32
  }
  func.func @transform_4(%arg0: i32) -> (i32, i32) {
    %c0_i32 = arith.constant 0 : i32
    %c0_i32_0 = arith.constant 0 : i32
    %c0_i32_1 = arith.constant 0 : i32
    return %c0_i32, %c0_i32_0 : i32, i32
  }
}

module attributes {stable_mosaic.version = 11 : i64} {
  func.func @_bn_relu_kernel(%arg0: i32, %arg1: memref<104x8xf32, #tpu.memory_space<vmem>>, %arg2: memref<1x8xf32, #tpu.memory_space<vmem>>, %arg3: memref<1x8xf32, #tpu.memory_space<vmem>>, %arg4: memref<1x8xf32, #tpu.memory_space<vmem>>, %arg5: memref<1x8xf32, #tpu.memory_space<vmem>>, %arg6: memref<104x8xf32, #tpu.memory_space<vmem>>) attributes {dimension_semantics = [#tpu.dimension_semantics<parallel>], iteration_bounds = array<i64: 1>, scalar_prefetch = 0 : i64, scratch_operands = 0 : i64, tpu.core_type = #tpu.core_type<tc>, window_params = [{transform_indices = @transform_0, window_bounds = array<i64: 104, 8>}, {pipeline_mode = #tpu.pipeline_mode<synchronous>, transform_indices = @transform_1, window_bounds = array<i64: 1, 8>}, {pipeline_mode = #tpu.pipeline_mode<synchronous>, transform_indices = @transform_2, window_bounds = array<i64: 1, 8>}, {pipeline_mode = #tpu.pipeline_mode<synchronous>, transform_indices = @transform_3, window_bounds = array<i64: 1, 8>}, {pipeline_mode = #tpu.pipeline_mode<synchronous>, transform_indices = @transform_4, window_bounds = array<i64: 1, 8>}, {transform_indices = @transform_5, window_bounds = array<i64: 104, 8>}]} {
    %c0 = arith.constant 0 : index
    %c0_0 = arith.constant 0 : index
    %0 = vector.load %arg2[%c0, %c0_0] : memref<1x8xf32, #tpu.memory_space<vmem>>, vector<1x8xf32>
    %cst = arith.constant 0.0102040814 : f32
    %1 = vector.broadcast %cst : f32 to vector<1x8xf32>
    %2 = arith.mulf %0, %1 : vector<1x8xf32>
    %c0_1 = arith.constant 0 : index
    %c0_2 = arith.constant 0 : index
    %3 = vector.load %arg3[%c0_1, %c0_2] : memref<1x8xf32, #tpu.memory_space<vmem>>, vector<1x8xf32>
    %cst_3 = arith.constant 0.0102040814 : f32
    %4 = vector.broadcast %cst_3 : f32 to vector<1x8xf32>
    %5 = arith.mulf %3, %4 : vector<1x8xf32>
    %6 = arith.mulf %2, %2 : vector<1x8xf32>
    %7 = arith.subf %5, %6 : vector<1x8xf32>
    %c0_4 = arith.constant 0 : index
    %c0_5 = arith.constant 0 : index
    %8 = vector.load %arg4[%c0_4, %c0_5] : memref<1x8xf32, #tpu.memory_space<vmem>>, vector<1x8xf32>
    %cst_6 = arith.constant 9.99999974E-6 : f32
    %9 = vector.broadcast %cst_6 : f32 to vector<1x8xf32>
    %10 = arith.addf %7, %9 : vector<1x8xf32>
    %11 = math.rsqrt %10 : vector<1x8xf32>
    %12 = arith.mulf %8, %11 : vector<1x8xf32>
    %c0_7 = arith.constant 0 : index
    %c0_8 = arith.constant 0 : index
    %13 = vector.load %arg5[%c0_7, %c0_8] : memref<1x8xf32, #tpu.memory_space<vmem>>, vector<1x8xf32>
    %14 = arith.mulf %2, %12 : vector<1x8xf32>
    %15 = arith.subf %13, %14 : vector<1x8xf32>
    %c0_9 = arith.constant 0 : index
    %c0_10 = arith.constant 0 : index
    %16 = vector.load %arg1[%c0_9, %c0_10] : memref<104x8xf32, #tpu.memory_space<vmem>>, vector<104x8xf32>
    %17 = vector.broadcast %12 : vector<1x8xf32> to vector<104x8xf32>
    %18 = arith.mulf %16, %17 : vector<104x8xf32>
    %19 = vector.broadcast %15 : vector<1x8xf32> to vector<104x8xf32>
    %20 = arith.addf %18, %19 : vector<104x8xf32>
    %cst_11 = arith.constant 0.000000e+00 : f32
    %21 = vector.broadcast %cst_11 : f32 to vector<104x8xf32>
    %22 = arith.maximumf %20, %21 : vector<104x8xf32>
    %c0_12 = arith.constant 0 : index
    %c0_13 = arith.constant 0 : index
    %23 = vector.load %arg6[%c0_12, %c0_13] : memref<104x8xf32, #tpu.memory_space<vmem>>, vector<104x8xf32>
    tpu.vector_store %arg6[%c0_12, %c0_13], %22 {strides = array<i32>} : memref<104x8xf32, #tpu.memory_space<vmem>>, vector<104x8xf32>,
    return
  }
  func.func @transform_0(%arg0: i32) -> (i32, i32) {
    %c0_i32 = arith.constant 0 : i32
    %c0_i32_0 = arith.constant 0 : i32
    return %arg0, %c0_i32 : i32, i32
  }
  func.func @transform_1(%arg0: i32) -> (i32, i32) {
    %c0_i32 = arith.constant 0 : i32
    %c0_i32_0 = arith.constant 0 : i32
    %c0_i32_1 = arith.constant 0 : i32
    return %c0_i32, %c0_i32_0 : i32, i32
  }
  func.func @transform_2(%arg0: i32) -> (i32, i32) {
    %c0_i32 = arith.constant 0 : i32
    %c0_i32_0 = arith.constant 0 : i32
    %c0_i32_1 = arith.constant 0 : i32
    return %c0_i32, %c0_i32_0 : i32, i32
  }
  func.func @transform_3(%arg0: i32) -> (i32, i32) {
    %c0_i32 = arith.constant 0 : i32
    %c0_i32_0 = arith.constant 0 : i32
    %c0_i32_1 = arith.constant 0 : i32
    return %c0_i32, %c0_i32_0 : i32, i32
  }
  func.func @transform_4(%arg0: i32) -> (i32, i32) {
    %c0_i32 = arith.constant 0 : i32
    %c0_i32_0 = arith.constant 0 : i32
    %c0_i32_1 = arith.constant 0 : i32
    return %c0_i32, %c0_i32_0 : i32, i32
  }
  func.func @transform_5(%arg0: i32) -> (i32, i32) {
    %c0_i32 = arith.constant 0 : i32
    %c0_i32_0 = arith.constant 0 : i32
    return %arg0, %c0_i32 : i32, i32
  }
}

module attributes {stable_mosaic.version = 11 : i64} {
  func.func @_conv_stats_kernel(%arg0: i32, %arg1: memref<24x72xf32, #tpu.memory_space<vmem>>, %arg2: memref<72x16xf32, #tpu.memory_space<vmem>>, %arg3: memref<24x16xf32, #tpu.memory_space<vmem>>, %arg4: memref<1x16xf32, #tpu.memory_space<vmem>>, %arg5: memref<1x16xf32, #tpu.memory_space<vmem>>) attributes {dimension_semantics = [#tpu.dimension_semantics<arbitrary>], iteration_bounds = array<i64: 1>, scalar_prefetch = 0 : i64, scratch_operands = 0 : i64, tpu.core_type = #tpu.core_type<tc>, window_params = [{transform_indices = @transform_0, window_bounds = array<i64: 24, 72>}, {pipeline_mode = #tpu.pipeline_mode<synchronous>, transform_indices = @transform_1, window_bounds = array<i64: 72, 16>}, {transform_indices = @transform_2, window_bounds = array<i64: 24, 16>}, {pipeline_mode = #tpu.pipeline_mode<synchronous>, transform_indices = @transform_3, window_bounds = array<i64: 1, 16>}, {pipeline_mode = #tpu.pipeline_mode<synchronous>, transform_indices = @transform_4, window_bounds = array<i64: 1, 16>}]} {
    %c0_i32 = arith.constant 0 : i32
    %0 = arith.cmpi eq, %arg0, %c0_i32 : i32
    %1 = arith.extui %0 : i1 to i32
    %c0_i32_0 = arith.constant 0 : i32
    %2 = arith.cmpi ne, %1, %c0_i32_0 : i32
    scf.if %2 {
      %cst_16 = arith.constant 0.000000e+00 : f32
      %18 = vector.broadcast %cst_16 : f32 to vector<1x16xf32>
      %c0_17 = arith.constant 0 : index
      %c0_18 = arith.constant 0 : index
      %19 = vector.load %arg4[%c0_17, %c0_18] : memref<1x16xf32, #tpu.memory_space<vmem>>, vector<1x16xf32>
      tpu.vector_store %arg4[%c0_17, %c0_18], %18 {strides = array<i32>} : memref<1x16xf32, #tpu.memory_space<vmem>>, vector<1x16xf32>,
      %cst_19 = arith.constant 0.000000e+00 : f32
      %20 = vector.broadcast %cst_19 : f32 to vector<1x16xf32>
      %c0_20 = arith.constant 0 : index
      %c0_21 = arith.constant 0 : index
      %21 = vector.load %arg5[%c0_20, %c0_21] : memref<1x16xf32, #tpu.memory_space<vmem>>, vector<1x16xf32>
      tpu.vector_store %arg5[%c0_20, %c0_21], %20 {strides = array<i32>} : memref<1x16xf32, #tpu.memory_space<vmem>>, vector<1x16xf32>,
    } else {
    }
    %c0 = arith.constant 0 : index
    %c0_1 = arith.constant 0 : index
    %3 = vector.load %arg1[%c0, %c0_1] : memref<24x72xf32, #tpu.memory_space<vmem>>, vector<24x72xf32>
    %c0_2 = arith.constant 0 : index
    %c0_3 = arith.constant 0 : index
    %4 = vector.load %arg2[%c0_2, %c0_3] : memref<72x16xf32, #tpu.memory_space<vmem>>, vector<72x16xf32>
    %cst = arith.constant dense<0.000000e+00> : vector<24x16xf32>
    %5 = tpu.matmul %3, %4, %cst {dimension_numbers = #tpu.dot_dimension_numbers<[1], [0], [0], [1], [0, 0, 1, 1], [], []>} : vector<24x72xf32>, vector<72x16xf32>, vector<24x16xf32> -> vector<24x16xf32>
    %c0_4 = arith.constant 0 : index
    %c0_5 = arith.constant 0 : index
    %6 = vector.load %arg3[%c0_4, %c0_5] : memref<24x16xf32, #tpu.memory_space<vmem>>, vector<24x16xf32>
    tpu.vector_store %arg3[%c0_4, %c0_5], %5 {strides = array<i32>} : memref<24x16xf32, #tpu.memory_space<vmem>>, vector<24x16xf32>,
    %c0_6 = arith.constant 0 : index
    %c0_7 = arith.constant 0 : index
    %7 = vector.load %arg4[%c0_6, %c0_7] : memref<1x16xf32, #tpu.memory_space<vmem>>, vector<1x16xf32>
    %cst_8 = arith.constant dense<0.000000e+00> : vector<16xf32>
    %8 = vector.multi_reduction <add>, %5, %cst_8 [0] : vector<24x16xf32> to vector<16xf32>
    %9 = vector.shape_cast %8 : vector<16xf32> to vector<1x16xf32>
    %10 = arith.addf %7, %9 : vector<1x16xf32>
    %c0_9 = arith.constant 0 : index
    %c0_10 = arith.constant 0 : index
    %11 = vector.load %arg4[%c0_9, %c0_10] : memref<1x16xf32, #tpu.memory_space<vmem>>, vector<1x16xf32>
    tpu.vector_store %arg4[%c0_9, %c0_10], %10 {strides = array<i32>} : memref<1x16xf32, #tpu.memory_space<vmem>>, vector<1x16xf32>,
    %c0_11 = arith.constant 0 : index
    %c0_12 = arith.constant 0 : index
    %12 = vector.load %arg5[%c0_11, %c0_12] : memref<1x16xf32, #tpu.memory_space<vmem>>, vector<1x16xf32>
    %13 = arith.mulf %5, %5 : vector<24x16xf32>
    %cst_13 = arith.constant dense<0.000000e+00> : vector<16xf32>
    %14 = vector.multi_reduction <add>, %13, %cst_13 [0] : vector<24x16xf32> to vector<16xf32>
    %15 = vector.shape_cast %14 : vector<16xf32> to vector<1x16xf32>
    %16 = arith.addf %12, %15 : vector<1x16xf32>
    %c0_14 = arith.constant 0 : index
    %c0_15 = arith.constant 0 : index
    %17 = vector.load %arg5[%c0_14, %c0_15] : memref<1x16xf32, #tpu.memory_space<vmem>>, vector<1x16xf32>
    tpu.vector_store %arg5[%c0_14, %c0_15], %16 {strides = array<i32>} : memref<1x16xf32, #tpu.memory_space<vmem>>, vector<1x16xf32>,
    return
  }
  func.func @transform_0(%arg0: i32) -> (i32, i32) {
    %c0_i32 = arith.constant 0 : i32
    %c0_i32_0 = arith.constant 0 : i32
    return %arg0, %c0_i32 : i32, i32
  }
  func.func @transform_1(%arg0: i32) -> (i32, i32) {
    %c0_i32 = arith.constant 0 : i32
    %c0_i32_0 = arith.constant 0 : i32
    %c0_i32_1 = arith.constant 0 : i32
    return %c0_i32, %c0_i32_0 : i32, i32
  }
  func.func @transform_2(%arg0: i32) -> (i32, i32) {
    %c0_i32 = arith.constant 0 : i32
    %c0_i32_0 = arith.constant 0 : i32
    return %arg0, %c0_i32 : i32, i32
  }
  func.func @transform_3(%arg0: i32) -> (i32, i32) {
    %c0_i32 = arith.constant 0 : i32
    %c0_i32_0 = arith.constant 0 : i32
    %c0_i32_1 = arith.constant 0 : i32
    return %c0_i32, %c0_i32_0 : i32, i32
  }
  func.func @transform_4(%arg0: i32) -> (i32, i32) {
    %c0_i32 = arith.constant 0 : i32
    %c0_i32_0 = arith.constant 0 : i32
    %c0_i32_1 = arith.constant 0 : i32
    return %c0_i32, %c0_i32_0 : i32, i32
  }
}

module attributes {stable_mosaic.version = 11 : i64} {
  func.func @_bn_relu_kernel(%arg0: i32, %arg1: memref<24x16xf32, #tpu.memory_space<vmem>>, %arg2: memref<1x16xf32, #tpu.memory_space<vmem>>, %arg3: memref<1x16xf32, #tpu.memory_space<vmem>>, %arg4: memref<1x16xf32, #tpu.memory_space<vmem>>, %arg5: memref<1x16xf32, #tpu.memory_space<vmem>>, %arg6: memref<24x16xf32, #tpu.memory_space<vmem>>) attributes {dimension_semantics = [#tpu.dimension_semantics<parallel>], iteration_bounds = array<i64: 1>, scalar_prefetch = 0 : i64, scratch_operands = 0 : i64, tpu.core_type = #tpu.core_type<tc>, window_params = [{transform_indices = @transform_0, window_bounds = array<i64: 24, 16>}, {pipeline_mode = #tpu.pipeline_mode<synchronous>, transform_indices = @transform_1, window_bounds = array<i64: 1, 16>}, {pipeline_mode = #tpu.pipeline_mode<synchronous>, transform_indices = @transform_2, window_bounds = array<i64: 1, 16>}, {pipeline_mode = #tpu.pipeline_mode<synchronous>, transform_indices = @transform_3, window_bounds = array<i64: 1, 16>}, {pipeline_mode = #tpu.pipeline_mode<synchronous>, transform_indices = @transform_4, window_bounds = array<i64: 1, 16>}, {transform_indices = @transform_5, window_bounds = array<i64: 24, 16>}]} {
    %c0 = arith.constant 0 : index
    %c0_0 = arith.constant 0 : index
    %0 = vector.load %arg2[%c0, %c0_0] : memref<1x16xf32, #tpu.memory_space<vmem>>, vector<1x16xf32>
    %cst = arith.constant 0.055555556 : f32
    %1 = vector.broadcast %cst : f32 to vector<1x16xf32>
    %2 = arith.mulf %0, %1 : vector<1x16xf32>
    %c0_1 = arith.constant 0 : index
    %c0_2 = arith.constant 0 : index
    %3 = vector.load %arg3[%c0_1, %c0_2] : memref<1x16xf32, #tpu.memory_space<vmem>>, vector<1x16xf32>
    %cst_3 = arith.constant 0.055555556 : f32
    %4 = vector.broadcast %cst_3 : f32 to vector<1x16xf32>
    %5 = arith.mulf %3, %4 : vector<1x16xf32>
    %6 = arith.mulf %2, %2 : vector<1x16xf32>
    %7 = arith.subf %5, %6 : vector<1x16xf32>
    %c0_4 = arith.constant 0 : index
    %c0_5 = arith.constant 0 : index
    %8 = vector.load %arg4[%c0_4, %c0_5] : memref<1x16xf32, #tpu.memory_space<vmem>>, vector<1x16xf32>
    %cst_6 = arith.constant 9.99999974E-6 : f32
    %9 = vector.broadcast %cst_6 : f32 to vector<1x16xf32>
    %10 = arith.addf %7, %9 : vector<1x16xf32>
    %11 = math.rsqrt %10 : vector<1x16xf32>
    %12 = arith.mulf %8, %11 : vector<1x16xf32>
    %c0_7 = arith.constant 0 : index
    %c0_8 = arith.constant 0 : index
    %13 = vector.load %arg5[%c0_7, %c0_8] : memref<1x16xf32, #tpu.memory_space<vmem>>, vector<1x16xf32>
    %14 = arith.mulf %2, %12 : vector<1x16xf32>
    %15 = arith.subf %13, %14 : vector<1x16xf32>
    %c0_9 = arith.constant 0 : index
    %c0_10 = arith.constant 0 : index
    %16 = vector.load %arg1[%c0_9, %c0_10] : memref<24x16xf32, #tpu.memory_space<vmem>>, vector<24x16xf32>
    %17 = vector.broadcast %12 : vector<1x16xf32> to vector<24x16xf32>
    %18 = arith.mulf %16, %17 : vector<24x16xf32>
    %19 = vector.broadcast %15 : vector<1x16xf32> to vector<24x16xf32>
    %20 = arith.addf %18, %19 : vector<24x16xf32>
    %cst_11 = arith.constant 0.000000e+00 : f32
    %21 = vector.broadcast %cst_11 : f32 to vector<24x16xf32>
    %22 = arith.maximumf %20, %21 : vector<24x16xf32>
    %c0_12 = arith.constant 0 : index
    %c0_13 = arith.constant 0 : index
    %23 = vector.load %arg6[%c0_12, %c0_13] : memref<24x16xf32, #tpu.memory_space<vmem>>, vector<24x16xf32>
    tpu.vector_store %arg6[%c0_12, %c0_13], %22 {strides = array<i32>} : memref<24x16xf32, #tpu.memory_space<vmem>>, vector<24x16xf32>,
    return
  }
  func.func @transform_0(%arg0: i32) -> (i32, i32) {
    %c0_i32 = arith.constant 0 : i32
    %c0_i32_0 = arith.constant 0 : i32
    return %arg0, %c0_i32 : i32, i32
  }
  func.func @transform_1(%arg0: i32) -> (i32, i32) {
    %c0_i32 = arith.constant 0 : i32
    %c0_i32_0 = arith.constant 0 : i32
    %c0_i32_1 = arith.constant 0 : i32
    return %c0_i32, %c0_i32_0 : i32, i32
  }
  func.func @transform_2(%arg0: i32) -> (i32, i32) {
    %c0_i32 = arith.constant 0 : i32
    %c0_i32_0 = arith.constant 0 : i32
    %c0_i32_1 = arith.constant 0 : i32
    return %c0_i32, %c0_i32_0 : i32, i32
  }
  func.func @transform_3(%arg0: i32) -> (i32, i32) {
    %c0_i32 = arith.constant 0 : i32
    %c0_i32_0 = arith.constant 0 : i32
    %c0_i32_1 = arith.constant 0 : i32
    return %c0_i32, %c0_i32_0 : i32, i32
  }
  func.func @transform_4(%arg0: i32) -> (i32, i32) {
    %c0_i32 = arith.constant 0 : i32
    %c0_i32_0 = arith.constant 0 : i32
    %c0_i32_1 = arith.constant 0 : i32
    return %c0_i32, %c0_i32_0 : i32, i32
  }
  func.func @transform_5(%arg0: i32) -> (i32, i32) {
    %c0_i32 = arith.constant 0 : i32
    %c0_i32_0 = arith.constant 0 : i32
    return %arg0, %c0_i32 : i32, i32
  }
}

module attributes {stable_mosaic.version = 11 : i64} {
  func.func @_mlp_kernel(%arg0: i32, %arg1: memref<8x144xf32, #tpu.memory_space<vmem>>, %arg2: memref<144x32xf32, #tpu.memory_space<vmem>>, %arg3: memref<1x32xf32, #tpu.memory_space<vmem>>, %arg4: memref<32x8xf32, #tpu.memory_space<vmem>>, %arg5: memref<1x8xf32, #tpu.memory_space<vmem>>, %arg6: memref<8x8xf32, #tpu.memory_space<vmem>>) attributes {dimension_semantics = [#tpu.dimension_semantics<parallel>], iteration_bounds = array<i64: 1>, scalar_prefetch = 0 : i64, scratch_operands = 0 : i64, tpu.core_type = #tpu.core_type<tc>, window_params = [{transform_indices = @transform_0, window_bounds = array<i64: 8, 144>}, {pipeline_mode = #tpu.pipeline_mode<synchronous>, transform_indices = @transform_1, window_bounds = array<i64: 144, 32>}, {pipeline_mode = #tpu.pipeline_mode<synchronous>, transform_indices = @transform_2, window_bounds = array<i64: 1, 32>}, {pipeline_mode = #tpu.pipeline_mode<synchronous>, transform_indices = @transform_3, window_bounds = array<i64: 32, 8>}, {pipeline_mode = #tpu.pipeline_mode<synchronous>, transform_indices = @transform_4, window_bounds = array<i64: 1, 8>}, {transform_indices = @transform_5, window_bounds = array<i64: 8, 8>}]} {
    %c0 = arith.constant 0 : index
    %c0_0 = arith.constant 0 : index
    %0 = vector.load %arg1[%c0, %c0_0] : memref<8x144xf32, #tpu.memory_space<vmem>>, vector<8x144xf32>
    %c0_1 = arith.constant 0 : index
    %c0_2 = arith.constant 0 : index
    %1 = vector.load %arg2[%c0_1, %c0_2] : memref<144x32xf32, #tpu.memory_space<vmem>>, vector<144x32xf32>
    %cst = arith.constant dense<0.000000e+00> : vector<8x32xf32>
    %2 = tpu.matmul %0, %1, %cst {dimension_numbers = #tpu.dot_dimension_numbers<[1], [0], [0], [1], [0, 0, 1, 1], [], []>} : vector<8x144xf32>, vector<144x32xf32>, vector<8x32xf32> -> vector<8x32xf32>
    %c0_3 = arith.constant 0 : index
    %c0_4 = arith.constant 0 : index
    %3 = vector.load %arg3[%c0_3, %c0_4] : memref<1x32xf32, #tpu.memory_space<vmem>>, vector<1x32xf32>
    %4 = vector.broadcast %3 : vector<1x32xf32> to vector<8x32xf32>
    %5 = arith.addf %2, %4 : vector<8x32xf32>
    %cst_5 = arith.constant 0.000000e+00 : f32
    %6 = vector.broadcast %cst_5 : f32 to vector<8x32xf32>
    %7 = arith.maximumf %5, %6 : vector<8x32xf32>
    %c0_6 = arith.constant 0 : index
    %c0_7 = arith.constant 0 : index
    %8 = vector.load %arg4[%c0_6, %c0_7] : memref<32x8xf32, #tpu.memory_space<vmem>>, vector<32x8xf32>
    %cst_8 = arith.constant dense<0.000000e+00> : vector<8x8xf32>
    %9 = tpu.matmul %7, %8, %cst_8 {dimension_numbers = #tpu.dot_dimension_numbers<[1], [0], [0], [1], [0, 0, 1, 1], [], []>} : vector<8x32xf32>, vector<32x8xf32>, vector<8x8xf32> -> vector<8x8xf32>
    %c0_9 = arith.constant 0 : index
    %c0_10 = arith.constant 0 : index
    %10 = vector.load %arg5[%c0_9, %c0_10] : memref<1x8xf32, #tpu.memory_space<vmem>>, vector<1x8xf32>
    %11 = vector.broadcast %10 : vector<1x8xf32> to vector<8x8xf32>
    %12 = arith.addf %9, %11 : vector<8x8xf32>
    %c0_11 = arith.constant 0 : index
    %c0_12 = arith.constant 0 : index
    %13 = vector.load %arg6[%c0_11, %c0_12] : memref<8x8xf32, #tpu.memory_space<vmem>>, vector<8x8xf32>
    tpu.vector_store %arg6[%c0_11, %c0_12], %12 {strides = array<i32>} : memref<8x8xf32, #tpu.memory_space<vmem>>, vector<8x8xf32>,
    return
  }
  func.func @transform_0(%arg0: i32) -> (i32, i32) {
    %c0_i32 = arith.constant 0 : i32
    %c0_i32_0 = arith.constant 0 : i32
    return %arg0, %c0_i32 : i32, i32
  }
  func.func @transform_1(%arg0: i32) -> (i32, i32) {
    %c0_i32 = arith.constant 0 : i32
    %c0_i32_0 = arith.constant 0 : i32
    %c0_i32_1 = arith.constant 0 : i32
    return %c0_i32, %c0_i32_0 : i32, i32
  }
  func.func @transform_2(%arg0: i32) -> (i32, i32) {
    %c0_i32 = arith.constant 0 : i32
    %c0_i32_0 = arith.constant 0 : i32
    %c0_i32_1 = arith.constant 0 : i32
    return %c0_i32, %c0_i32_0 : i32, i32
  }
  func.func @transform_3(%arg0: i32) -> (i32, i32) {
    %c0_i32 = arith.constant 0 : i32
    %c0_i32_0 = arith.constant 0 : i32
    %c0_i32_1 = arith.constant 0 : i32
    return %c0_i32, %c0_i32_0 : i32, i32
  }
  func.func @transform_4(%arg0: i32) -> (i32, i32) {
    %c0_i32 = arith.constant 0 : i32
    %c0_i32_0 = arith.constant 0 : i32
    %c0_i32_1 = arith.constant 0 : i32
    return %c0_i32, %c0_i32_0 : i32, i32
  }
  func.func @transform_5(%arg0: i32) -> (i32, i32) {
    %c0_i32 = arith.constant 0 : i32
    %c0_i32_0 = arith.constant 0 : i32
    return %arg0, %c0_i32 : i32, i32
  }
}

</mosaic_0001>

<bundles_post_ra>
// kernel: _lambda_.6
= control target key start
LH: loop header
LB: loop body
LE: loop exit
PB: predicated region body
PF: predicated region fallthrough
CT: control target
= control target key end

     0   :  { %v47_v7 = vlaneseq  ;;  %vm97_vm0 = vcmask 64512   ;;  %s250_s1 = inlined_call_operand.vmem [shape: f32[1,8], index: 1, kind: input, shape index: {}]   ;;  %s251_s2 = inlined_call_operand.vmem [shape: f32[1,8], index: 2, kind: input, shape index: {}]   ;;  %s252_s3 = inlined_call_operand.vmem [shape: f32[1,8], index: 3, kind: input, shape index: {}]   ;;  %s253_s0 = inlined_call_operand.vmem [shape: f32[104,8], index: 0, kind: input, shape index: {}]   ;;  %s254_s4 = inlined_call_operand.vmem [shape: f32[1,8], index: 4, kind: input, shape index: {}]   ;;  %s255_s5 = inlined_call_operand.vmem [shape: f32[104,8], index: 5, kind: output, shape index: {}]  }
   0x1   :  { %v20_v0 = vld [vmem:[%s250_s1] sm:$0x1]  ;;  %v34_v15 = vld [vmem:[%s253_s0 + $0x8] sm:$0xff]  ;;  %v35_v16 = vld [vmem:[%s253_s0 + $0x10] sm:$0xff] }
   0x2   :  { %v22_v1 = vld [vmem:[%s251_s2] sm:$0x1]  ;;  %v21_v2 = vmul.f32 0.010204081, %v20_v0  ;;  %v48_v8 = vshrl.u32 %v47_v7, 7  ;;  %v36_v17 = vld [vmem:[%s253_s0 + $0x18] sm:$0xff] }
   0x3   :  { %v23_v3 = vmul.f32 0.010204081, %v22_v1  ;;  %v26_v9 = vld [vmem:[%s252_s3] sm:$0x1]  ;;  %v38_v21 = vld [vmem:[%s253_s0 + $0x28] sm:$0xff]  ;;  %v39_v22 = vld [vmem:[%s253_s0 + $0x30] sm:$0xff] }
   0x4   :  { %v24_v4 = vmul.f32 %v21_v2, %v21_v2  ;;  %v49_v10 = vsub.s32 0, %v48_v8  ;;  %v30_v13 = vld [vmem:[%s254_s4] sm:$0x1]  ;;  %v40_v23 = vld [vmem:[%s253_s0 + $0x38] sm:$0xff]  ;;  %v42_v25 = vld [vmem:[%s253_s0 + $0x48] sm:$0xff] }
   0x5   :  { %v33_v14 = vld [vmem:[%s253_s0] sm:$0xff]  ;;  %v43_v30 = vld [vmem:[%s253_s0 + $0x50] sm:$0xff]  ;;  %v44_v31 = vld [vmem:[%s253_s0 + $0x58] sm:$0xff] }
   0x6   :  { %v25_v5 = vsub.f32 %v23_v3, %v24_v4  ;;  %v37_v20 = vld [vmem:[%s253_s0 + $0x20] sm:$0xff] }
   0x7   :  { %v41_v24 = vld [vmem:[%s253_s0 + $0x40] sm:$0xff] }
   0x8   :  { %v27_v6 = vadd.f32 1e-05, %v25_v5  ;;  %v45_v32 = vld [vmem:[%s253_s0 + $0x60] sm:$0xff] }
   0xa   :  { %115 = vrsqrt.f32 %v27_v6 }
  0x14   :  { %v116_v11 = vpop.eup %115 }
  0x15   :  { %v29_v12 = vmul.f32 %v116_v11, %v26_v9 }
  0x17   :  { %v31_v18 = vmul.f32 %v29_v12, %v21_v2  ;;  %v50_v19 = vrot.slane %v29_v12, %v49_v10 }
  0x19   :  { %v32_v26 = vsub.f32 %v30_v13, %v31_v18  ;;  %v52_v27 = vmul.f32 %v50_v19, %v33_v14  ;;  %v53_v28 = vmul.f32 %v50_v19, %v34_v15  ;;  %v54_v29 = vmul.f32 %v50_v19, %v35_v16 }
  0x1a   :  { %v55_v33 = vmul.f32 %v50_v19, %v36_v17  ;;  %v56_v34 = vmul.f32 %v50_v19, %v37_v20  ;;  %v57_v35 = vmul.f32 %v50_v19, %v38_v21  ;;  %v58_v36 = vmul.f32 %v50_v19, %v39_v22 }
  0x1b   :  { %v69_v37 = vrot.slane %v32_v26, %v49_v10  ;;  %v59_v38 = vmul.f32 %v50_v19, %v40_v23  ;;  %v60_v39 = vmul.f32 %v50_v19, %v41_v24  ;;  %v61_v40 = vmul.f32 %v50_v19, %v42_v25 }
  0x1c   :  { %v62_v41 = vmul.f32 %v50_v19, %v43_v30  ;;  %v63_v42 = vmul.f32 %v50_v19, %v44_v31  ;;  %v64_v43 = vmul.f32 %v50_v19, %v45_v32 }
  0x1d   :  { %v71_v44 = vadd.f32 %v69_v37, %v52_v27  ;;  %v72_v45 = vadd.f32 %v69_v37, %v53_v28  ;;  %v73_v46 = vadd.f32 %v69_v37, %v54_v29  ;;  %v74_v47 = vadd.f32 %v69_v37, %v55_v33 }
  0x1e   :  { %v75_v48 = vadd.f32 %v69_v37, %v56_v34  ;;  %v76_v49 = vadd.f32 %v69_v37, %v57_v35  ;;  %v77_v50 = vadd.f32 %v69_v37, %v58_v36  ;;  %v78_v51 = vadd.f32 %v69_v37, %v59_v38 }
  0x1f   :  { %v84_v52 = vmax.f32 %v71_v44, 0.0  ;;  %v85_v53 = vmax.f32 %v72_v45, 0.0  ;;  %v86_v54 = vmax.f32 %v73_v46, 0.0  ;;  %v87_v55 = vmax.f32 %v74_v47, 0.0 }
  0x20   :  { %v88_v56 = vmax.f32 %v75_v48, 0.0  ;;  %v89_v57 = vmax.f32 %v76_v49, 0.0  ;;  %v90_v58 = vmax.f32 %v77_v50, 0.0  ;;  %v91_v59 = vmax.f32 %v78_v51, 0.0 }
  0x21   :  { %98 = vst.msk [vmem:[%s255_s5] sm:$0xff] %vm97_vm0, %v84_v52  ;;  %99 = vst.msk [vmem:[%s255_s5 + $0x8] sm:$0xff] %vm97_vm0, %v85_v53  ;;  %v79_v60 = vadd.f32 %v69_v37, %v60_v39  ;;  %v80_v61 = vadd.f32 %v69_v37, %v61_v40  ;;  %v81_v62 = vadd.f32 %v69_v37, %v62_v41 }
  0x22   :  { %100 = vst.msk [vmem:[%s255_s5 + $0x10] sm:$0xff] %vm97_vm0, %v86_v54  ;;  %101 = vst.msk [vmem:[%s255_s5 + $0x18] sm:$0xff] %vm97_vm0, %v87_v55  ;;  %v82_v63 = vadd.f32 %v69_v37, %v63_v42  ;;  %v83_v0 = vadd.f32 %v69_v37, %v64_v43 }
  0x23   :  { %102 = vst.msk [vmem:[%s255_s5 + $0x20] sm:$0xff] %vm97_vm0, %v88_v56  ;;  %103 = vst.msk [vmem:[%s255_s5 + $0x28] sm:$0xff] %vm97_vm0, %v89_v57  ;;  %v92_v1 = vmax.f32 %v79_v60, 0.0  ;;  %v93_v2 = vmax.f32 %v80_v61, 0.0  ;;  %v94_v3 = vmax.f32 %v81_v62, 0.0 }
  0x24   :  { %104 = vst.msk [vmem:[%s255_s5 + $0x30] sm:$0xff] %vm97_vm0, %v90_v58  ;;  %105 = vst.msk [vmem:[%s255_s5 + $0x38] sm:$0xff] %vm97_vm0, %v91_v59  ;;  %v95_v4 = vmax.f32 %v82_v63, 0.0  ;;  %v96_v5 = vmax.f32 %v83_v0, 0.0 }
  0x25   :  { %106 = vst.msk [vmem:[%s255_s5 + $0x40] sm:$0xff] %vm97_vm0, %v92_v1  ;;  %107 = vst.msk [vmem:[%s255_s5 + $0x48] sm:$0xff] %vm97_vm0, %v93_v2 }
  0x26   :  { %108 = vst.msk [vmem:[%s255_s5 + $0x50] sm:$0xff] %vm97_vm0, %v94_v3  ;;  %109 = vst.msk [vmem:[%s255_s5 + $0x58] sm:$0xff] %vm97_vm0, %v95_v4 }
  0x27   :  { %110 = vst.msk [vmem:[%s255_s5 + $0x60] sm:$0xff] %vm97_vm0, %v96_v5 }

// kernel: _lambda_.5
= control target key start
LH: loop header
LB: loop body
LE: loop exit
PB: predicated region body
PF: predicated region fallthrough
CT: control target
= control target key end

     0   :  { %v417_v0 = vmov 0.0|0.0   ;;  %vm418_vm0 = vmmov 0   ;;  %v419_v4 = vmov 0.0   ;;  %vm79_vm1 = vcmask 1043456   ;;  %s637_s1 = inlined_call_operand.vmem [shape: f32[36,8], index: 1, kind: input, shape index: {}]   ;;  %s638_s0 = inlined_call_operand.vmem [shape: f32[104,36], index: 0, kind: input, shape index: {}]   ;;  %s639_s3 = inlined_call_operand.vmem [shape: f32[1,8], index: 3, kind: output, shape index: {1}]   ;;  %s640_s4 = inlined_call_operand.vmem [shape: f32[1,8], index: 4, kind: output, shape index: {2}]   ;;  %s641_s2 = inlined_call_operand.vmem [shape: f32[104,8], index: 2, kind: output, shape index: {0}]  }
   0x1   :  { %402 = vmatprep.subr.bf16.mxu0 %v417_v0  ;;  %v34_v1 = vld [vmem:[%s637_s1] sm:$0xff]  ;;  %v35_v2 = vld [vmem:[%s637_s1 + $0x8] sm:$0xff]  ;;  %v36_v3 = vld [vmem:[%s637_s1 + $0x10] sm:$0xff]  ;;  %363 = vmatprep.mubr.msk.f32.mxu0 %vm418_vm0, %v419_v4  ;;  %vm39_vm2 = vcmask 293888   ;;  %vm18_vm3 = vcmask 57344   ;;  %vm213_vm4 = vcmask 64512  }
   0x2   :  { %v403_v5 = vpack.c.bf16 %v35_v2, %v34_v1  ;;  %v37_v6 = vld [vmem:[%s637_s1 + $0x18] sm:$0xff]  ;;  %408 = vmatprep.subr.bf16.mxu1 %v417_v0  ;;  %384 = vmatprep.mubr.msk.f32.mxu1 %vm418_vm0, %v419_v4  ;;  %v38_v8 = vld [vmem:[%s637_s1 + $0x20] sm:$0xf]  ;;  %v22_v11 = vld [vmem:[%s638_s0 + $0x8] sm:$0xff]  ;;  %19 = vst.msk [vmem:[%s639_s3] sm:$0x1] %vm18_vm3, %v419_v4 }
   0x3   :  { %v406_v7 = vpack.c.bf16 %v37_v6, %v36_v3  ;;  %v21_v9 = vld [vmem:[%s638_s0] sm:$0xff]  ;;  %v28_v10 = vld [vmem:[%s638_s0 + $0x38] sm:$0xff]  ;;  %v23_v13 = vld [vmem:[%s638_s0 + $0x10] sm:$0xff]  ;;  %20 = vst.msk [vmem:[%s640_s4] sm:$0x1] %vm18_vm3, %v419_v4 }
   0x4   :  { %404 = vmatpush3.bf16.msra.mxu0 %v403_v5  ;;  %411 = vmatpush3.bf16.msra.mxu1 %v403_v5  ;;  %v29_v12 = vld [vmem:[%s638_s0 + $0x40] sm:$0xff]  ;;  %v30_v14 = vld [vmem:[%s638_s0 + $0x48] sm:$0xff]  ;;  %v24_v15 = vld [vmem:[%s638_s0 + $0x18] sm:$0xff] }
   0x5   :  { %405 = vmatprep.subr.bf16.mxu0 %v417_v0  ;;  %409 = vmatprep.subr.bf16.mxu1 %v417_v0  ;;  %v31_v16 = vld [vmem:[%s638_s0 + $0x50] sm:$0xff]  ;;  %v25_v17 = vld [vmem:[%s638_s0 + $0x20] sm:$0xff]  ;;  %v32_v18 = vld [vmem:[%s638_s0 + $0x58] sm:$0xff] }
   0x6   :  { %v26_v19 = vld [vmem:[%s638_s0 + $0x28] sm:$0xff]  ;;  %v33_v20 = vld [vmem:[%s638_s0 + $0x60] sm:$0xff]  ;;  %v27_v21 = vld [vmem:[%s638_s0 + $0x30] sm:$0xff] }
   0x8   :  { %407 = vmatpush3.bf16.msra.mxu0 %v406_v7  ;;  %412 = vmatpush3.bf16.msra.mxu1 %v406_v7 }
   0x9   :  { %361 = vmatprep.subr.mxu0 %v419_v4  ;;  %410 = vmatprep.subr.mxu1 %v419_v4 }
   0xc   :  { %362 = vmatpush3.msk.msra.mxu0 %vm79_vm1, %v38_v8  ;;  %413 = vmatpush3.msk.msra.mxu1 %vm79_vm1, %v38_v8 }
   0xd   :  { %364 = vmatmul.mubr.msk.f32.vlgmr.msra.gmra.mrb[0].mxu0 %vm39_vm2, %v21_v9  ;;  %385 = vmatmul.mubr.msk.f32.vlgmr.msra.gmra.mrb[0].mxu1 %vm39_vm2, %v28_v10 }
   0xe   :  { %366 = vmatprep.mubr.msk.f32.mxu0 %vm418_vm0, %v419_v4  ;;  %387 = vmatprep.mubr.msk.f32.mxu1 %vm418_vm0, %v419_v4 }
  0x11   :  { %367 = vmatmul.mubr.msk.f32.gmra.mrb[2].mxu0 %vm39_vm2, %v22_v11  ;;  %388 = vmatmul.mubr.msk.f32.gmra.mrb[2].mxu1 %vm39_vm2, %v29_v12 }
  0x12   :  { %369 = vmatprep.mubr.msk.f32.mxu0 %vm418_vm0, %v419_v4  ;;  %390 = vmatprep.mubr.msk.f32.mxu1 %vm418_vm0, %v419_v4 }
  0x15   :  { %370 = vmatmul.mubr.msk.f32.gmra.mrb[4].mxu0 %vm39_vm2, %v23_v13  ;;  %391 = vmatmul.mubr.msk.f32.gmra.mrb[4].mxu1 %vm39_vm2, %v30_v14 }
  0x16   :  { %372 = vmatprep.mubr.msk.f32.mxu0 %vm418_vm0, %v419_v4  ;;  %393 = vmatprep.mubr.msk.f32.mxu1 %vm418_vm0, %v419_v4 }
  0x19   :  { %373 = vmatmul.mubr.msk.f32.gmra.mrb[6].mxu0 %vm39_vm2, %v24_v15  ;;  %394 = vmatmul.mubr.msk.f32.gmra.mrb[6].mxu1 %vm39_vm2, %v31_v16 }
  0x1a   :  { %375 = vmatprep.mubr.msk.f32.mxu0 %vm418_vm0, %v419_v4  ;;  %396 = vmatprep.mubr.msk.f32.mxu1 %vm418_vm0, %v419_v4 }
  0x1d   :  { %376 = vmatmul.mubr.msk.f32.gmra.mrb[8].mxu0 %vm39_vm2, %v25_v17  ;;  %397 = vmatmul.mubr.msk.f32.gmra.mrb[8].mxu1 %vm39_vm2, %v32_v18 }
  0x1e   :  { %378 = vmatprep.mubr.msk.f32.mxu0 %vm418_vm0, %v419_v4  ;;  %399 = vmatprep.mubr.msk.f32.mxu1 %vm418_vm0, %v419_v4 }
  0x21   :  { %379 = vmatmul.mubr.msk.f32.gmra.mrb[10].mxu0 %vm39_vm2, %v26_v19  ;;  %400 = vmatmul.mubr.msk.f32.gmra.mrb[10].mxu1 %vm39_vm2, %v33_v20 }
  0x22   :  { %381 = vmatprep.mubr.msk.f32.mxu0 %vm418_vm0, %v419_v4 }
  0x25   :  { %382 = vmatmul.mubr.msk.f32.gmra.mrb[12].mxu0 %vm39_vm2, %v27_v21 }
  0xe0   :  { %v149_v22 = vpop.f32.mrb[0].mxu0  ;;  %v533_v23 = vpop.f32.mrb[0].mxu1 }
  0xe1   :  { %214 = vst.msk [vmem:[%s641_s2] sm:$0xff] %vm213_vm4, %v149_v22  ;;  %v365_v24 = vpop.f32.mrb[1].mxu0  ;;  %221 = vst.msk [vmem:[%s641_s2 + $0x38] sm:$0xff] %vm213_vm4, %v533_v23  ;;  %v386_v25 = vpop.f32.mrb[1].mxu1  ;;  %v263_v26 = vmul.f32 %v149_v22, %v149_v22  ;;  %v228_v29 = vsel %vm213_vm4, %v149_v22, 0.0  ;;  %v270_v11 = vmul.f32 %v533_v23, %v533_v23  ;;  %v241_v16 = vsel %vm213_vm4, %v533_v23, 0.0 }
  0xe3   :  { %v276_v35 = vsel %vm213_vm4, %v263_v26, 0.0  ;;  %v289_v21 = vsel %vm213_vm4, %v270_v11, 0.0 }
  0xe4   :  { %v154_v27 = vpop.f32.mrb[2].mxu0  ;;  %v544_v28 = vpop.f32.mrb[2].mxu1 }
  0xe5   :  { %215 = vst.msk [vmem:[%s641_s2 + $0x8] sm:$0xff] %vm213_vm4, %v154_v27  ;;  %v229_v30 = vsel %vm213_vm4, %v154_v27, 0.0  ;;  %v264_v31 = vmul.f32 %v154_v27, %v154_v27  ;;  %v368_v32 = vpop.f32.mrb[3].mxu0  ;;  %222 = vst.msk [vmem:[%s641_s2 + $0x40] sm:$0xff] %vm213_vm4, %v544_v28  ;;  %v389_v33 = vpop.f32.mrb[3].mxu1  ;;  %v271_v17 = vmul.f32 %v544_v28, %v544_v28  ;;  %v243_v22 = vsel %vm213_vm4, %v544_v28, 0.0 }
  0xe6   :  { %v230_v34 = vadd.f32 %v229_v30, %v228_v29 }
  0xe7   :  { %v277_v36 = vsel %vm213_vm4, %v264_v31, 0.0  ;;  %v291_v27 = vsel %vm213_vm4, %v271_v17, 0.0 }
  0xe8   :  { %v278_v37 = vadd.f32 %v277_v36, %v276_v35  ;;  %v159_v38 = vpop.f32.mrb[4].mxu0  ;;  %v194_v39 = vpop.f32.mrb[4].mxu1 }
  0xe9   :  { %216 = vst.msk [vmem:[%s641_s2 + $0x10] sm:$0xff] %vm213_vm4, %v159_v38  ;;  %v231_v40 = vsel %vm213_vm4, %v159_v38, 0.0  ;;  %v265_v41 = vmul.f32 %v159_v38, %v159_v38  ;;  %v371_v42 = vpop.f32.mrb[5].mxu0  ;;  %223 = vst.msk [vmem:[%s641_s2 + $0x48] sm:$0xff] %vm213_vm4, %v194_v39  ;;  %v392_v43 = vpop.f32.mrb[5].mxu1  ;;  %v272_v24 = vmul.f32 %v194_v39, %v194_v39  ;;  %v245_v29 = vsel %vm213_vm4, %v194_v39, 0.0 }
  0xea   :  { %v232_v44 = vadd.f32 %v231_v40, %v230_v34 }
  0xeb   :  { %v279_v45 = vsel %vm213_vm4, %v265_v41, 0.0  ;;  %v293_v32 = vsel %vm213_vm4, %v272_v24, 0.0 }
  0xec   :  { %v280_v46 = vadd.f32 %v279_v45, %v278_v37  ;;  %v164_v47 = vpop.f32.mrb[6].mxu0  ;;  %v199_v48 = vpop.f32.mrb[6].mxu1 }
  0xed   :  { %217 = vst.msk [vmem:[%s641_s2 + $0x18] sm:$0xff] %vm213_vm4, %v164_v47  ;;  %v233_v49 = vsel %vm213_vm4, %v164_v47, 0.0  ;;  %v266_v50 = vmul.f32 %v164_v47, %v164_v47  ;;  %v374_v51 = vpop.f32.mrb[7].mxu0  ;;  %224 = vst.msk [vmem:[%s641_s2 + $0x50] sm:$0xff] %vm213_vm4, %v199_v48  ;;  %v395_v52 = vpop.f32.mrb[7].mxu1  ;;  %v273_v23 = vmul.f32 %v199_v48, %v199_v48  ;;  %v247_v33 = vsel %vm213_vm4, %v199_v48, 0.0 }
  0xee   :  { %v234_v53 = vadd.f32 %v233_v49, %v232_v44 }
  0xef   :  { %v281_v54 = vsel %vm213_vm4, %v266_v50, 0.0  ;;  %v295_v28 = vsel %vm213_vm4, %v273_v23, 0.0 }
  0xf0   :  { %v282_v55 = vadd.f32 %v281_v54, %v280_v46  ;;  %v169_v56 = vpop.f32.mrb[8].mxu0  ;;  %v204_v57 = vpop.f32.mrb[8].mxu1 }
  0xf1   :  { %218 = vst.msk [vmem:[%s641_s2 + $0x20] sm:$0xff] %vm213_vm4, %v169_v56  ;;  %v235_v58 = vsel %vm213_vm4, %v169_v56, 0.0  ;;  %v267_v59 = vmul.f32 %v169_v56, %v169_v56  ;;  %v377_v60 = vpop.f32.mrb[9].mxu0  ;;  %225 = vst.msk [vmem:[%s641_s2 + $0x58] sm:$0xff] %vm213_vm4, %v204_v57  ;;  %v398_v61 = vpop.f32.mrb[9].mxu1  ;;  %v274_v34 = vmul.f32 %v204_v57, %v204_v57  ;;  %v249_v38 = vsel %vm213_vm4, %v204_v57, 0.0 }
  0xf2   :  { %v236_v62 = vadd.f32 %v235_v58, %v234_v53  ;;  %v227_v56 = vld [vmem:[%s639_s3] sm:$0x1] }
  0xf3   :  { %v283_v63 = vsel %vm213_vm4, %v267_v59, 0.0  ;;  %v297_v39 = vsel %vm213_vm4, %v274_v34, 0.0  ;;  %v262_v59 = vld [vmem:[%s640_s4] sm:$0x1] }
  0xf4   :  { %v284_v0 = vadd.f32 %v283_v63, %v282_v55  ;;  %v174_v1 = vpop.f32.mrb[10].mxu0  ;;  %v209_v2 = vpop.f32.mrb[10].mxu1 }
  0xf5   :  { %219 = vst.msk [vmem:[%s641_s2 + $0x28] sm:$0xff] %vm213_vm4, %v174_v1  ;;  %v237_v3 = vsel %vm213_vm4, %v174_v1, 0.0  ;;  %v268_v4 = vmul.f32 %v174_v1, %v174_v1  ;;  %v380_v5 = vpop.f32.mrb[11].mxu0  ;;  %226 = vst.msk [vmem:[%s641_s2 + $0x60] sm:$0xff] %vm213_vm4, %v209_v2  ;;  %v401_v6 = vpop.f32.mrb[11].mxu1  ;;  %v275_v35 = vmul.f32 %v209_v2, %v209_v2  ;;  %v251_v40 = vsel %vm213_vm4, %v209_v2, 0.0 }
  0xf6   :  { %v238_v7 = vadd.f32 %v237_v3, %v236_v62 }
  0xf7   :  { %v285_v8 = vsel %vm213_vm4, %v268_v4, 0.0  ;;  %v299_v43 = vsel %vm213_vm4, %v275_v35, 0.0 }
  0xf8   :  { %v286_v9 = vadd.f32 %v285_v8, %v284_v0  ;;  %v179_v10 = vpop.f32.mrb[12].mxu0 }
  0xf9   :  { %220 = vst.msk [vmem:[%s641_s2 + $0x30] sm:$0xff] %vm213_vm4, %v179_v10  ;;  %v239_v12 = vsel %vm213_vm4, %v179_v10, 0.0  ;;  %v269_v13 = vmul.f32 %v179_v10, %v179_v10  ;;  %v383_v14 = vpop.f32.mrb[13].mxu0 }
  0xfa   :  { %v240_v15 = vadd.f32 %v239_v12, %v238_v7 }
  0xfb   :  { %v287_v18 = vsel %vm213_vm4, %v269_v13, 0.0 }
  0xfc   :  { %v242_v19 = vadd.f32 %v241_v16, %v240_v15  ;;  %v288_v20 = vadd.f32 %v287_v18, %v286_v9 }
  0xfe   :  { %v290_v25 = vadd.f32 %v289_v21, %v288_v20  ;;  %v244_v26 = vadd.f32 %v243_v22, %v242_v19 }
 0x100   :  { %v246_v30 = vadd.f32 %v245_v29, %v244_v26  ;;  %v292_v31 = vadd.f32 %v291_v27, %v290_v25 }
 0x102   :  { %v248_v36 = vadd.f32 %v247_v33, %v246_v30  ;;  %v294_v37 = vadd.f32 %v293_v32, %v292_v31 }
 0x104   :  { %v296_v41 = vadd.f32 %v295_v28, %v294_v37  ;;  %v250_v42 = vadd.f32 %v249_v38, %v248_v36 }
 0x106   :  { %v298_v44 = vadd.f32 %v297_v39, %v296_v41  ;;  %v252_v45 = vadd.f32 %v251_v40, %v250_v42 }
 0x108   :  { %v253_v46 = vrot.slane %v252_v45, 4  ;;  %v300_v47 = vadd.f32 %v299_v43, %v298_v44 }
 0x10a   :  { %v254_v48 = vadd.f32 %v253_v46, %v252_v45  ;;  %v301_v49 = vrot.slane %v300_v47, 4 }
 0x10c   :  { %v255_v50 = vrot.slane %v254_v48, 2  ;;  %v302_v51 = vadd.f32 %v301_v49, %v300_v47 }
 0x10e   :  { %v256_v52 = vadd.f32 %v255_v50, %v254_v48  ;;  %v303_v53 = vrot.slane %v302_v51, 2 }
 0x110   :  { %v257_v54 = vrot.slane %v256_v52, 1  ;;  %v304_v55 = vadd.f32 %v303_v53, %v302_v51 }
 0x112   :  { %v258_v57 = vadd.f32 %v257_v54, %v256_v52  ;;  %v305_v58 = vrot.slane %v304_v55, 1 }
 0x114   :  { %v259_v60 = vadd.f32 %v258_v57, %v227_v56  ;;  %v306_v61 = vadd.f32 %v305_v58, %v304_v55 }
 0x116   :  { %261 = vst.msk [vmem:[%s639_s3] sm:$0x1] %vm18_vm3, %v259_v60  ;;  %v307_v62 = vadd.f32 %v306_v61, %v262_v59 }
 0x118   :  { %308 = vst.msk [vmem:[%s640_s4] sm:$0x1] %vm18_vm3, %v307_v62 }

// kernel: _lambda_.7
= control target key start
LH: loop header
LB: loop body
LE: loop exit
PB: predicated region body
PF: predicated region fallthrough
CT: control target
= control target key end

     0   :  { %v238_v0 = vmov 0.0|0.0   ;;  %vm239_vm0 = vmmov 0   ;;  %v240_v6 = vmov 0.0   ;;  %vm33_vm1 = vcmask 588800   ;;  %s345_s1 = inlined_call_operand.vmem [shape: f32[72,16], index: 1, kind: input, shape index: {}]   ;;  %s346_s0 = inlined_call_operand.vmem [shape: f32[24,72], index: 0, kind: input, shape index: {}]   ;;  %s347_s3 = inlined_call_operand.vmem [shape: f32[1,16], index: 3, kind: output, shape index: {1}]   ;;  %s348_s4 = inlined_call_operand.vmem [shape: f32[1,16], index: 4, kind: output, shape index: {2}]   ;;  %s349_s2 = inlined_call_operand.vmem [shape: f32[24,16], index: 2, kind: output, shape index: {0}]  }
   0x1   :  { %213 = vmatprep.subr.bf16.mxu0 %v238_v0  ;;  %225 = vmatprep.subr.bf16.mxu1 %v238_v0  ;;  %v24_v1 = vld [vmem:[%s345_s1] sm:$0xff]  ;;  %v25_v2 = vld [vmem:[%s345_s1 + $0x8] sm:$0xff]  ;;  %v26_v3 = vld [vmem:[%s345_s1 + $0x10] sm:$0xff]  ;;  %vm18_vm2 = vcmask 122880   ;;  %vm123_vm3 = vcmask 130048  }
   0x2   :  { %v214_v4 = vpack.c.bf16 %v25_v2, %v24_v1  ;;  %v27_v5 = vld [vmem:[%s345_s1 + $0x18] sm:$0xff]  ;;  %204 = vmatprep.mubr.msk.f32.mxu0 %vm239_vm0, %v240_v6  ;;  %207 = vmatprep.mubr.msk.f32.mxu1 %vm239_vm0, %v240_v6  ;;  %v28_v8 = vld [vmem:[%s345_s1 + $0x20] sm:$0xff]  ;;  %v29_v9 = vld [vmem:[%s345_s1 + $0x28] sm:$0xff]  ;;  %19 = vst.msk [vmem:[%s347_s3] sm:$0x1] %vm18_vm2, %v240_v6 }
   0x3   :  { %v217_v7 = vpack.c.bf16 %v27_v5, %v26_v3  ;;  %v220_v10 = vpack.c.bf16 %v29_v9, %v28_v8  ;;  %v30_v11 = vld [vmem:[%s345_s1 + $0x30] sm:$0xff]  ;;  %v31_v12 = vld [vmem:[%s345_s1 + $0x38] sm:$0xff]  ;;  %v32_v14 = vld [vmem:[%s345_s1 + $0x40] sm:$0xff]  ;;  %20 = vst.msk [vmem:[%s348_s4] sm:$0x1] %vm18_vm2, %v240_v6 }
   0x4   :  { %215 = vmatpush3.bf16.msra.mxu0 %v214_v4  ;;  %230 = vmatpush3.bf16.msra.mxu1 %v214_v4  ;;  %v223_v13 = vpack.c.bf16 %v31_v12, %v30_v11  ;;  %v21_v15 = vld [vmem:[%s346_s0] sm:$0xff]  ;;  %v22_v16 = vld [vmem:[%s346_s0 + $0x8] sm:$0xff]  ;;  %v23_v17 = vld [vmem:[%s346_s0 + $0x10] sm:$0xff] }
   0x5   :  { %216 = vmatprep.subr.bf16.mxu0 %v238_v0  ;;  %226 = vmatprep.subr.bf16.mxu1 %v238_v0 }
   0x8   :  { %218 = vmatpush3.bf16.msra.mxu0 %v217_v7  ;;  %231 = vmatpush3.bf16.msra.mxu1 %v217_v7 }
   0x9   :  { %219 = vmatprep.subr.bf16.mxu0 %v238_v0  ;;  %227 = vmatprep.subr.bf16.mxu1 %v238_v0  ;;  %v127_v46 = vld [vmem:[%s347_s3] sm:$0x1] }
   0xa   :  { %v142_v49 = vld [vmem:[%s348_s4] sm:$0x1] }
   0xc   :  { %221 = vmatpush3.bf16.msra.mxu0 %v220_v10  ;;  %232 = vmatpush3.bf16.msra.mxu1 %v220_v10 }
   0xd   :  { %222 = vmatprep.subr.bf16.mxu0 %v238_v0  ;;  %228 = vmatprep.subr.bf16.mxu1 %v238_v0 }
  0x10   :  { %224 = vmatpush3.bf16.msra.mxu0 %v223_v13  ;;  %233 = vmatpush3.bf16.msra.mxu1 %v223_v13 }
  0x11   :  { %202 = vmatprep.subr.mxu0 %v240_v6  ;;  %229 = vmatprep.subr.mxu1 %v240_v6 }
  0x14   :  { %203 = vmatpush3.msra.mxu0 %v32_v14  ;;  %234 = vmatpush3.msra.mxu1 %v32_v14 }
  0x15   :  { %205 = vmatmul.mubr.msk.f32.vlgmr.msra.gmra.mrb[0].mxu0 %vm33_vm1, %v21_v15  ;;  %208 = vmatmul.mubr.msk.f32.vlgmr.msra.gmra.mrb[0].mxu1 %vm33_vm1, %v22_v16 }
  0x16   :  { %210 = vmatprep.mubr.msk.f32.mxu1 %vm239_vm0, %v240_v6 }
  0x19   :  { %211 = vmatmul.mubr.msk.f32.gmra.mrb[2].mxu1 %vm33_vm1, %v23_v17 }
  0xe8   :  { %v109_v18 = vpop.f32.mrb[0].mxu0  ;;  %v114_v19 = vpop.f32.mrb[0].mxu1 }
  0xe9   :  { %124 = vst.msk [vmem:[%s349_s2] sm:$0xff] %vm123_vm3, %v109_v18  ;;  %v128_v20 = vsel %vm123_vm3, %v109_v18, 0.0  ;;  %v143_v21 = vmul.f32 %v109_v18, %v109_v18  ;;  %125 = vst.msk [vmem:[%s349_s2 + $0x8] sm:$0xff] %vm123_vm3, %v114_v19  ;;  %v129_v22 = vsel %vm123_vm3, %v114_v19, 0.0  ;;  %v144_v23 = vmul.f32 %v114_v19, %v114_v19  ;;  %v209_v24 = vpop.f32.mrb[1].mxu1  ;;  %v206_v25 = vpop.f32.mrb[1].mxu0 }
  0xea   :  { %v130_v26 = vadd.f32 %v129_v22, %v128_v20 }
  0xeb   :  { %v146_v27 = vsel %vm123_vm3, %v143_v21, 0.0  ;;  %v147_v28 = vsel %vm123_vm3, %v144_v23, 0.0 }
  0xec   :  { %v148_v29 = vadd.f32 %v147_v28, %v146_v27  ;;  %v119_v30 = vpop.f32.mrb[2].mxu1 }
  0xed   :  { %126 = vst.msk [vmem:[%s349_s2 + $0x10] sm:$0xff] %vm123_vm3, %v119_v30  ;;  %v131_v31 = vsel %vm123_vm3, %v119_v30, 0.0  ;;  %v145_v32 = vmul.f32 %v119_v30, %v119_v30  ;;  %v212_v33 = vpop.f32.mrb[3].mxu1 }
  0xee   :  { %v132_v34 = vadd.f32 %v131_v31, %v130_v26 }
  0xef   :  { %v149_v35 = vsel %vm123_vm3, %v145_v32, 0.0 }
  0xf0   :  { %v133_v36 = vrot.slane %v132_v34, 4  ;;  %v150_v37 = vadd.f32 %v149_v35, %v148_v29 }
  0xf2   :  { %v134_v38 = vadd.f32 %v133_v36, %v132_v34  ;;  %v151_v39 = vrot.slane %v150_v37, 4 }
  0xf4   :  { %v135_v40 = vrot.slane %v134_v38, 2  ;;  %v152_v41 = vadd.f32 %v151_v39, %v150_v37 }
  0xf6   :  { %v136_v42 = vadd.f32 %v135_v40, %v134_v38  ;;  %v153_v43 = vrot.slane %v152_v41, 2 }
  0xf8   :  { %v137_v44 = vrot.slane %v136_v42, 1  ;;  %v154_v45 = vadd.f32 %v153_v43, %v152_v41 }
  0xfa   :  { %v138_v47 = vadd.f32 %v137_v44, %v136_v42  ;;  %v155_v48 = vrot.slane %v154_v45, 1 }
  0xfc   :  { %v139_v50 = vadd.f32 %v138_v47, %v127_v46  ;;  %v156_v51 = vadd.f32 %v155_v48, %v154_v45 }
  0xfe   :  { %141 = vst.msk [vmem:[%s347_s3] sm:$0x1] %vm18_vm2, %v139_v50  ;;  %v157_v52 = vadd.f32 %v156_v51, %v142_v49 }
 0x100   :  { %158 = vst.msk [vmem:[%s348_s4] sm:$0x1] %vm18_vm2, %v157_v52 }

// kernel: _lambda_.8
= control target key start
LH: loop header
LB: loop body
LE: loop exit
PB: predicated region body
PF: predicated region fallthrough
CT: control target
= control target key end

     0   :  { %v37_v7 = vlaneseq  ;;  %vm57_vm0 = vcmask 130048   ;;  %s127_s1 = inlined_call_operand.vmem [shape: f32[1,16], index: 1, kind: input, shape index: {}]   ;;  %s128_s2 = inlined_call_operand.vmem [shape: f32[1,16], index: 2, kind: input, shape index: {}]   ;;  %s129_s3 = inlined_call_operand.vmem [shape: f32[1,16], index: 3, kind: input, shape index: {}]   ;;  %s130_s4 = inlined_call_operand.vmem [shape: f32[1,16], index: 4, kind: input, shape index: {}]   ;;  %s131_s0 = inlined_call_operand.vmem [shape: f32[24,16], index: 0, kind: input, shape index: {}]   ;;  %s132_s5 = inlined_call_operand.vmem [shape: f32[24,16], index: 5, kind: output, shape index: {}]  }
   0x1   :  { %v20_v0 = vld [vmem:[%s127_s1] sm:$0x1]  ;;  %v34_v15 = vld [vmem:[%s131_s0 + $0x8] sm:$0xff]  ;;  %v35_v16 = vld [vmem:[%s131_s0 + $0x10] sm:$0xff] }
   0x2   :  { %v22_v1 = vld [vmem:[%s128_s2] sm:$0x1]  ;;  %v21_v2 = vmul.f32 0.055555556, %v20_v0  ;;  %v38_v8 = vshrl.u32 %v37_v7, 7 }
   0x3   :  { %v23_v3 = vmul.f32 0.055555556, %v22_v1  ;;  %v26_v9 = vld [vmem:[%s129_s3] sm:$0x1] }
   0x4   :  { %v24_v4 = vmul.f32 %v21_v2, %v21_v2  ;;  %v39_v10 = vsub.s32 0, %v38_v8  ;;  %v30_v13 = vld [vmem:[%s130_s4] sm:$0x1] }
   0x5   :  { %v33_v14 = vld [vmem:[%s131_s0] sm:$0xff] }
   0x6   :  { %v25_v5 = vsub.f32 %v23_v3, %v24_v4 }
   0x8   :  { %v27_v6 = vadd.f32 1e-05, %v25_v5 }
   0xa   :  { %65 = vrsqrt.f32 %v27_v6 }
  0x14   :  { %v66_v11 = vpop.eup %65 }
  0x15   :  { %v29_v12 = vmul.f32 %v66_v11, %v26_v9 }
  0x17   :  { %v31_v17 = vmul.f32 %v29_v12, %v21_v2  ;;  %v40_v18 = vrot.slane %v29_v12, %v39_v10 }
  0x19   :  { %v32_v19 = vsub.f32 %v30_v13, %v31_v17  ;;  %v42_v20 = vmul.f32 %v40_v18, %v33_v14  ;;  %v43_v21 = vmul.f32 %v40_v18, %v34_v15  ;;  %v44_v22 = vmul.f32 %v40_v18, %v35_v16 }
  0x1b   :  { %v49_v23 = vrot.slane %v32_v19, %v39_v10 }
  0x1d   :  { %v51_v24 = vadd.f32 %v49_v23, %v42_v20  ;;  %v52_v25 = vadd.f32 %v49_v23, %v43_v21  ;;  %v53_v26 = vadd.f32 %v49_v23, %v44_v22 }
  0x1f   :  { %v54_v27 = vmax.f32 %v51_v24, 0.0  ;;  %v55_v28 = vmax.f32 %v52_v25, 0.0  ;;  %v56_v29 = vmax.f32 %v53_v26, 0.0 }
  0x21   :  { %58 = vst.msk [vmem:[%s132_s5] sm:$0xff] %vm57_vm0, %v54_v27  ;;  %59 = vst.msk [vmem:[%s132_s5 + $0x8] sm:$0xff] %vm57_vm0, %v55_v28 }
  0x22   :  { %60 = vst.msk [vmem:[%s132_s5 + $0x10] sm:$0xff] %vm57_vm0, %v56_v29 }

// kernel: _lambda_.9
= control target key start
LH: loop header
LB: loop body
LE: loop exit
PB: predicated region body
PF: predicated region fallthrough
CT: control target
= control target key end

     0   :  { %v269_v0 = vmov 0.0|0.0   ;;  %vm47_vm0 = vcmask 130048   ;;  %vm270_vm1 = vmmov 0   ;;  %v271_v36 = vmov 0.0   ;;  %s383_s1 = inlined_call_operand.vmem [shape: f32[144,32], index: 1, kind: input, shape index: {}]   ;;  %s384_s0 = inlined_call_operand.vmem [shape: f32[8,144], index: 0, kind: input, shape index: {}]   ;;  %s385_s3 = inlined_call_operand.vmem [shape: f32[32,8], index: 3, kind: input, shape index: {}]   ;;  %s386_s2 = inlined_call_operand.vmem [shape: f32[1,32], index: 2, kind: input, shape index: {}]   ;;  %s387_s4 = inlined_call_operand.vmem [shape: f32[1,8], index: 4, kind: input, shape index: {}]   ;;  %s388_s5 = inlined_call_operand.vmem [shape: f32[8,8], index: 5, kind: output, shape index: {}]  }
   0x1   :  { %233 = vmatprep.subr.bf16.mxu0 %v269_v0  ;;  %v22_v1 = vld [vmem:[%s383_s1] sm:$0xff]  ;;  %v23_v2 = vld [vmem:[%s383_s1 + $0x8] sm:$0xff]  ;;  %v24_v3 = vld [vmem:[%s383_s1 + $0x10] sm:$0xff]  ;;  %260 = vmatprep.subr.bf16.mxu1 %v269_v0  ;;  %vm133_vm2 = vcmask 261120   ;;  %vm207_vm3 = vcmask 64512  }
   0x2   :  { %v234_v4 = vpack.c.bf16 %v23_v2, %v22_v1  ;;  %v25_v5 = vld [vmem:[%s383_s1 + $0x18] sm:$0xff]  ;;  %v26_v7 = vld [vmem:[%s383_s1 + $0x20] sm:$0xff]  ;;  %v27_v8 = vld [vmem:[%s383_s1 + $0x28] sm:$0xff]  ;;  %230 = vmatprep.mubr.msk.f32.mxu1 %vm270_vm1, %v271_v36 }
   0x3   :  { %v237_v6 = vpack.c.bf16 %v25_v5, %v24_v3  ;;  %v21_v9 = vld [vmem:[%s384_s0 + $0x8] sm:$0xff]  ;;  %v122_v10 = vld [vmem:[%s385_s3] sm:$0xff]  ;;  %v240_v11 = vpack.c.bf16 %v27_v8, %v26_v7  ;;  %v28_v13 = vld [vmem:[%s383_s1 + $0x30] sm:$0xff] }
   0x4   :  { %235 = vmatpush1.bf16.msra.mxu0 %v234_v4  ;;  %214 = vmatprep.mubr.msk.f32.mxu0 %vm47_vm0, %v21_v9  ;;  %v123_v12 = vld [vmem:[%s385_s3 + $0x8] sm:$0xff]  ;;  %v29_v14 = vld [vmem:[%s383_s1 + $0x38] sm:$0xff]  ;;  %v30_v17 = vld [vmem:[%s383_s1 + $0x40] sm:$0xff] }
   0x5   :  { %236 = vmatprep.subr.bf16.mxu0 %v269_v0  ;;  %v261_v15 = vpack.c.bf16 %v123_v12, %v122_v10  ;;  %v243_v16 = vpack.c.bf16 %v29_v14, %v28_v13  ;;  %v31_v18 = vld [vmem:[%s383_s1 + $0x48] sm:$0xff]  ;;  %v32_v20 = vld [vmem:[%s383_s1 + $0x50] sm:$0xff]  ;;  %v33_v21 = vld [vmem:[%s383_s1 + $0x58] sm:$0xff] }
   0x6   :  { %v246_v19 = vpack.c.bf16 %v31_v18, %v30_v17  ;;  %v249_v22 = vpack.c.bf16 %v33_v21, %v32_v20  ;;  %v34_v23 = vld [vmem:[%s383_s1 + $0x60] sm:$0xff]  ;;  %v35_v24 = vld [vmem:[%s383_s1 + $0x68] sm:$0xff]  ;;  %v36_v26 = vld [vmem:[%s383_s1 + $0x70] sm:$0xff] }
   0x7   :  { %262 = vmatpush3.bf16.msra.mxu1 %v261_v15  ;;  %v252_v25 = vpack.c.bf16 %v35_v24, %v34_v23  ;;  %v37_v27 = vld [vmem:[%s383_s1 + $0x78] sm:$0xff]  ;;  %v38_v29 = vld [vmem:[%s383_s1 + $0x80] sm:$0xff]  ;;  %v39_v30 = vld [vmem:[%s383_s1 + $0x88] sm:$0xff] }
   0x8   :  { %238 = vmatpush1.bf16.msra.mxu0 %v237_v6  ;;  %263 = vmatprep.subr.bf16.mxu1 %v269_v0  ;;  %v255_v28 = vpack.c.bf16 %v37_v27, %v36_v26  ;;  %v258_v31 = vpack.c.bf16 %v39_v30, %v38_v29  ;;  %v20_v32 = vld [vmem:[%s384_s0] sm:$0xff]  ;;  %v124_v33 = vld [vmem:[%s385_s3 + $0x10] sm:$0xff]  ;;  %v125_v34 = vld [vmem:[%s385_s3 + $0x18] sm:$0xff] }
   0x9   :  { %239 = vmatprep.subr.bf16.mxu0 %v269_v0  ;;  %v264_v35 = vpack.c.bf16 %v125_v34, %v124_v33  ;;  %v213_v37 = vld [vmem:[%s386_s2] ss:$0 sm:$0xff] }
   0xa   :  { %v215_v42 = vld [vmem:[%s387_s4] ss:$0 sm:$0xff] }
   0xb   :  { %265 = vmatpush3.bf16.msra.mxu1 %v264_v35 }
   0xc   :  { %241 = vmatpush1.bf16.msra.mxu0 %v240_v11 }
   0xd   :  { %242 = vmatprep.subr.bf16.mxu0 %v269_v0 }
  0x10   :  { %244 = vmatpush1.bf16.msra.mxu0 %v243_v16 }
  0x11   :  { %245 = vmatprep.subr.bf16.mxu0 %v269_v0 }
  0x14   :  { %247 = vmatpush1.bf16.msra.mxu0 %v246_v19 }
  0x15   :  { %248 = vmatprep.subr.bf16.mxu0 %v269_v0 }
  0x18   :  { %250 = vmatpush1.bf16.msra.mxu0 %v249_v22 }
  0x19   :  { %251 = vmatprep.subr.bf16.mxu0 %v269_v0 }
  0x1c   :  { %253 = vmatpush1.bf16.msra.mxu0 %v252_v25 }
  0x1d   :  { %254 = vmatprep.subr.bf16.mxu0 %v269_v0 }
  0x20   :  { %256 = vmatpush1.bf16.msra.mxu0 %v255_v28 }
  0x21   :  { %257 = vmatprep.subr.bf16.mxu0 %v269_v0 }
  0x24   :  { %259 = vmatpush1.bf16.msra.mxu0 %v258_v31 }
  0x27   :  { %116 = vmatmul.mubr.f32.vlgmr.msra.gmra.mrb[0].mxu0 %v20_v32 }
  0xfa   :  { %v117_v38 = vpop.f32.mrb[0].mxu0 }
  0xfb   :  { %v118_v39 = vadd.f32 %v213_v37, %v117_v38  ;;  %v119_v40 = vpop.f32.mrb[1].mxu0 }
  0xfd   :  { %v121_v41 = vmax.f32 %v118_v39, 0.0 }
  0xff   :  { %231 = vmatmul.mubr.msk.f32.vlgmr.msra.gmra.mrb[0].mxu1 %vm133_vm2, %v121_v41 }
 0x1d2   :  { %v203_v43 = vpop.f32.mrb[0].mxu1 }
 0x1d3   :  { %v204_v44 = vadd.f32 %v215_v42, %v203_v43  ;;  %v232_v45 = vpop.f32.mrb[1].mxu1 }
 0x1d5   :  { %208 = vst.msk [vmem:[%s388_s5] sm:$0xff] %vm207_vm3, %v204_v44 }

</bundles_post_ra>
